<compile_context>
chip_gen: v7x
topology: tpu7x:2x2x1
jax: 0.10.0
libtpu: 0.0.40
codegen_flags: <defaults>
</compile_context>

<pallas_src>
import jax
import jax.numpy as jnp
from jax.experimental import pallas as pl
from jax.experimental.pallas import tpu as pltpu


def _round_up(n, m):
    return (n + m - 1) // m * m


def _decoder_kernel(x_ref, w1_ref, b1_ref, w2_ref, b2_ref, o_ref):
    # In-kernel cast to the matmul dtype (fused; avoids an extra HBM pass on x).
    x = x_ref[...].astype(w1_ref.dtype)
    # First Linear on the MXU (f32 accumulation), f32 bias + ReLU on the VPU.
    h = jnp.dot(x, w1_ref[...], preferred_element_type=jnp.float32)
    h = jnp.maximum(h + b1_ref[...], 0.0)                    # (TM,H) + (1,H)
    # Second Linear (inputs re-cast to bf16 for the MXU) + bias.
    # Note: h loses ~8 mantissa bits here vs a pure-f32 reference (documented,
    # covered by test tolerance).
    out = jnp.dot(h.astype(w2_ref.dtype), w2_ref[...],
                  preferred_element_type=jnp.float32)
    o_ref[...] = (out + b2_ref[...]).astype(o_ref.dtype)


def prepare_decoder_params(w1, b1, w2, b2, *, matmul_dtype=jnp.bfloat16):
    """Pad (lane-dense multiples of 128) and cast the static parameters ONCE.

    Call this at model-init time and reuse the result every forward step;
    rebuilding padded copies per call adds HBM passes ahead of a
    microsecond-scale kernel.

    w1: (d_model, H) first Linear weight, pre-transposed (== torch W1.T)
    b1: (1, H) or (H,)
    w2: (H, P) second Linear weight, pre-transposed (== torch W2.T)
    b2: (1, P) or (P,)
    Returns ((w1p, b1p, w2p, b2p), (D, H, P)).
    """
    D, H = w1.shape
    P = w2.shape[1]
    Dp, Hp, Pp = _round_up(D, 128), _round_up(H, 128), _round_up(P, 128)
    # Zero padding is math-neutral: extra x cols hit zero w1 rows, extra H cols
    # are ReLU(0)=0 into zero w2 rows, extra P cols are sliced off at the end.
    w1p = jnp.zeros((Dp, Hp), matmul_dtype).at[:D, :H].set(w1.astype(matmul_dtype))
    b1p = jnp.zeros((1, Hp), jnp.float32).at[:, :H].set(
        b1.reshape(1, H).astype(jnp.float32))
    w2p = jnp.zeros((Hp, Pp), matmul_dtype).at[:H, :P].set(w2.astype(matmul_dtype))
    b2p = jnp.zeros((1, Pp), jnp.float32).at[:, :P].set(
        b2.reshape(1, P).astype(jnp.float32))
    return (w1p, b1p, w2p, b2p), (D, H, P)


def resnet_decoder(x, params, dims, *, tm=1024, out_dtype=jnp.bfloat16):
    """Forward pass of ResnetDecoder: Linear -> ReLU -> Linear.

    x:      (B, d_model) activations (any float dtype; cast to bf16 in-kernel)
    params: output of prepare_decoder_params (padded bf16 weights, f32 biases)
    dims:   (D, H, P) true (unpadded) feature dims
    Returns (B, P) in out_dtype.
    """
    w1p, b1p, w2p, b2p = params
    D, H, P = dims
    B = x.shape[0]
    Dp, Hp = w1p.shape
    Pp = w2p.shape[1]

    # Batch tile: multiple of 16 (bf16 sublane packing), large (512-1024) to sit
    # near the HBM roofline, and capped at ~half the batch so the grid has >= 2
    # steps whenever the batch allows it (both v7x TensorCores get work).
    half_batch = max(16, _round_up((B + 1) // 2, 16))
    TM = min(_round_up(tm, 16), half_batch)
    Bp = _round_up(B, TM)

    # Fast path: pass x straight through (resnet18 d_model=512 is already a
    # multiple of 128 and B is normally a multiple of TM) -> no wrapper
    # pad/cast round trip over the dominant HBM input.
    if (D, B) == (Dp, Bp):
        xp = x
    else:
        xp = jnp.zeros((Bp, Dp), x.dtype).at[:B, :D].set(x)

    x_item = jnp.dtype(xp.dtype).itemsize
    w_item = jnp.dtype(w1p.dtype).itemsize
    o_item = jnp.dtype(out_dtype).itemsize
    cost = pl.CostEstimate(
        flops=2 * Bp * Dp * Hp + 2 * Bp * Hp * Pp,
        transcendentals=0,
        bytes_accessed=(Bp * Dp * x_item          # x (dominant, read once)
                        + Dp * Hp * w_item        # w1 (bf16)
                        + Hp * 4                  # b1 (f32)
                        + Hp * Pp * w_item        # w2 (bf16)
                        + Pp * 4                  # b2 (f32)
                        + Bp * Pp * o_item),      # out
    )

    # Constant-block-index operands: single buffer (no re-DMA happens anyway).
    resident = dict(pipeline_mode=pl.Buffered(1))

    out = pl.pallas_call(
        _decoder_kernel,
        out_shape=jax.ShapeDtypeStruct((Bp, Pp), out_dtype),
        grid_spec=pl.GridSpec(
            grid=(Bp // TM,),
            in_specs=[
                pl.BlockSpec((TM, Dp), lambda i: (i, 0)),             # x (pipelined)
                pl.BlockSpec((Dp, Hp), lambda i: (0, 0), **resident),  # w1 resident
                pl.BlockSpec((1, Hp), lambda i: (0, 0), **resident),   # b1 resident
                pl.BlockSpec((Hp, Pp), lambda i: (0, 0), **resident),  # w2 resident
                pl.BlockSpec((1, Pp), lambda i: (0, 0), **resident),   # b2 resident
            ],
            out_specs=pl.BlockSpec((TM, Pp), lambda i: (i, 0)),
        ),
        compiler_params=pltpu.CompilerParams(
            dimension_semantics=("parallel",)),
        cost_estimate=cost,
    )(xp, w1p, b1p, w2p, b2p)

    return out[:B, :P]


def resnet_decoder_ref(x, w1, b1, w2, b2):
    h = jnp.maximum(x @ w1 + b1, 0.0)
    return h @ w2 + b2


if __name__ == "__main__":
    # Shapes consistent with the module: d_model = resnet18 fc.in_features = 512.
    batch = 64
    d_model = 512
    decoder_hidden_dim = 128
    decoder_projection_dim = 64

    key = jax.random.PRNGKey(0)
    kx, k1, kb1, k2, kb2 = jax.random.split(key, 5)

    x = jax.random.normal(kx, (batch, d_model), dtype=jnp.float32)
    # Deterministic synthetic parameters (Linear weights pre-transposed).
    w1 = jax.random.normal(k1, (d_model, decoder_hidden_dim),
                           dtype=jnp.float32) * 0.05
    b1 = jax.random.normal(kb1, (1, decoder_hidden_dim), dtype=jnp.float32) * 0.05
    w2 = jax.random.normal(k2, (decoder_hidden_dim, decoder_projection_dim),
                           dtype=jnp.float32) * 0.05
    b2 = jax.random.normal(kb2, (1, decoder_projection_dim),
                           dtype=jnp.float32) * 0.05

    # Pad + cast the static parameters once, outside the hot path.
    params, dims = prepare_decoder_params(w1, b1, w2, b2)

    # Default tm=1024 -> TM=32 here -> grid=(2,): exercises the multi-step,
    # two-TC-friendly pipelined path, with the no-pad fast path on x (512%128==0).
    out = resnet_decoder(x, params, dims)
    jax.block_until_ready(out)

    # Reference with the same bf16-cast matmul inputs (f32 accumulation),
    # including the bf16 re-cast of the hidden activation.
    bf = lambda a: a.astype(jnp.bfloat16).astype(jnp.float32)
    h_ref = jnp.maximum(bf(x) @ bf(w1) + b1, 0.0)
    ref = bf(h_ref) @ bf(w2) + b2

    assert out.shape == (batch, decoder_projection_dim)
    assert out.dtype == jnp.bfloat16
    out_f32 = out.astype(jnp.float32)
    err = float(jnp.max(jnp.abs(out_f32 - ref)))
    assert jnp.allclose(out_f32, ref, atol=3e-2, rtol=3e-2), err

    print("KERNEL_OK")
</pallas_src>

<mosaic_0001>
module attributes {stable_mosaic.version = 11 : i64} {
  func.func @_decoder_kernel(%arg0: i32, %arg1: memref<32x512xf32, #tpu.memory_space<vmem>>, %arg2: memref<512x128xbf16, #tpu.memory_space<vmem>>, %arg3: memref<1x128xf32, #tpu.memory_space<vmem>>, %arg4: memref<128x128xbf16, #tpu.memory_space<vmem>>, %arg5: memref<1x128xf32, #tpu.memory_space<vmem>>, %arg6: memref<32x128xbf16, #tpu.memory_space<vmem>>) attributes {dimension_semantics = [#tpu.dimension_semantics<parallel>], iteration_bounds = array<i64: 2>, scalar_prefetch = 0 : i64, scratch_operands = 0 : i64, tpu.core_type = #tpu.core_type<tc>, window_params = [{transform_indices = @transform_0, window_bounds = array<i64: 32, 512>}, {pipeline_mode = #tpu.pipeline_mode<synchronous>, transform_indices = @transform_1, window_bounds = array<i64: 512, 128>}, {pipeline_mode = #tpu.pipeline_mode<synchronous>, transform_indices = @transform_2, window_bounds = array<i64: 1, 128>}, {pipeline_mode = #tpu.pipeline_mode<synchronous>, transform_indices = @transform_3, window_bounds = array<i64: 128, 128>}, {pipeline_mode = #tpu.pipeline_mode<synchronous>, transform_indices = @transform_4, window_bounds = array<i64: 1, 128>}, {transform_indices = @transform_5, window_bounds = array<i64: 32, 128>}]} {
    %c0 = arith.constant 0 : index
    %c0_0 = arith.constant 0 : index
    %0 = vector.load %arg1[%c0, %c0_0] : memref<32x512xf32, #tpu.memory_space<vmem>>, vector<32x512xf32>
    %1 = arith.truncf %0 : vector<32x512xf32> to vector<32x512xbf16>
    %c0_1 = arith.constant 0 : index
    %c0_2 = arith.constant 0 : index
    %2 = vector.load %arg2[%c0_1, %c0_2] : memref<512x128xbf16, #tpu.memory_space<vmem>>, vector<512x128xbf16>
    %cst = arith.constant dense<0.000000e+00> : vector<32x128xf32>
    %3 = tpu.matmul %1, %2, %cst {dimension_numbers = #tpu.dot_dimension_numbers<[1], [0], [0], [1], [0, 0, 1, 1], [], []>} : vector<32x512xbf16>, vector<512x128xbf16>, vector<32x128xf32> -> vector<32x128xf32>
    %c0_3 = arith.constant 0 : index
    %c0_4 = arith.constant 0 : index
    %4 = vector.load %arg3[%c0_3, %c0_4] : memref<1x128xf32, #tpu.memory_space<vmem>>, vector<1x128xf32>
    %5 = vector.broadcast %4 : vector<1x128xf32> to vector<32x128xf32>
    %6 = arith.addf %3, %5 : vector<32x128xf32>
    %cst_5 = arith.constant 0.000000e+00 : f32
    %7 = vector.broadcast %cst_5 : f32 to vector<32x128xf32>
    %8 = arith.maximumf %6, %7 : vector<32x128xf32>
    %9 = arith.truncf %8 : vector<32x128xf32> to vector<32x128xbf16>
    %c0_6 = arith.constant 0 : index
    %c0_7 = arith.constant 0 : index
    %10 = vector.load %arg4[%c0_6, %c0_7] : memref<128x128xbf16, #tpu.memory_space<vmem>>, vector<128x128xbf16>
    %cst_8 = arith.constant dense<0.000000e+00> : vector<32x128xf32>
    %11 = tpu.matmul %9, %10, %cst_8 {dimension_numbers = #tpu.dot_dimension_numbers<[1], [0], [0], [1], [0, 0, 1, 1], [], []>} : vector<32x128xbf16>, vector<128x128xbf16>, vector<32x128xf32> -> vector<32x128xf32>
    %c0_9 = arith.constant 0 : index
    %c0_10 = arith.constant 0 : index
    %12 = vector.load %arg5[%c0_9, %c0_10] : memref<1x128xf32, #tpu.memory_space<vmem>>, vector<1x128xf32>
    %13 = vector.broadcast %12 : vector<1x128xf32> to vector<32x128xf32>
    %14 = arith.addf %11, %13 : vector<32x128xf32>
    %15 = arith.truncf %14 : vector<32x128xf32> to vector<32x128xbf16>
    %c0_11 = arith.constant 0 : index
    %c0_12 = arith.constant 0 : index
    %16 = vector.load %arg6[%c0_11, %c0_12] : memref<32x128xbf16, #tpu.memory_space<vmem>>, vector<32x128xbf16>
    tpu.vector_store %arg6[%c0_11, %c0_12], %15 {strides = array<i32>} : memref<32x128xbf16, #tpu.memory_space<vmem>>, vector<32x128xbf16>,
    return
  }
  func.func @transform_0(%arg0: i32) -> (i32, i32) {
    %c0_i32 = arith.constant 0 : i32
    %c0_i32_0 = arith.constant 0 : i32
    return %arg0, %c0_i32 : i32, i32
  }
  func.func @transform_1(%arg0: i32) -> (i32, i32) {
    %c0_i32 = arith.constant 0 : i32
    %c0_i32_0 = arith.constant 0 : i32
    %c0_i32_1 = arith.constant 0 : i32
    return %c0_i32, %c0_i32_0 : i32, i32
  }
  func.func @transform_2(%arg0: i32) -> (i32, i32) {
    %c0_i32 = arith.constant 0 : i32
    %c0_i32_0 = arith.constant 0 : i32
    %c0_i32_1 = arith.constant 0 : i32
    return %c0_i32, %c0_i32_0 : i32, i32
  }
  func.func @transform_3(%arg0: i32) -> (i32, i32) {
    %c0_i32 = arith.constant 0 : i32
    %c0_i32_0 = arith.constant 0 : i32
    %c0_i32_1 = arith.constant 0 : i32
    return %c0_i32, %c0_i32_0 : i32, i32
  }
  func.func @transform_4(%arg0: i32) -> (i32, i32) {
    %c0_i32 = arith.constant 0 : i32
    %c0_i32_0 = arith.constant 0 : i32
    %c0_i32_1 = arith.constant 0 : i32
    return %c0_i32, %c0_i32_0 : i32, i32
  }
  func.func @transform_5(%arg0: i32) -> (i32, i32) {
    %c0_i32 = arith.constant 0 : i32
    %c0_i32_0 = arith.constant 0 : i32
    return %arg0, %c0_i32 : i32, i32
  }
}

</mosaic_0001>

<bundles_post_ra>
// kernel: tpu_custom_call.1
= control target key start
LH: loop header
LB: loop body
LE: loop exit
PB: predicated region body
PF: predicated region fallthrough
CT: control target
= control target key end

     0   :  { %10 = vsyncpa [#allocation3], 0  ;;  %s1652_s0 = inlined_call_operand.hbm [shape: f32[64,512], index: 0, kind: input, shape index: {}]   ;;  %s1653_s1 = inlined_call_operand.hbm [shape: bf16[512,128], index: 1, kind: input, shape index: {}]   ;;  %s1654_s2 = inlined_call_operand.vmem [shape: f32[1,128], index: 2, kind: input, shape index: {}]   ;;  %s1655_s3 = inlined_call_operand.hbm [shape: bf16[128,128], index: 3, kind: input, shape index: {}]   ;;  %s1656_s4 = inlined_call_operand.vmem [shape: f32[1,128], index: 4, kind: input, shape index: {}]   ;;  %s1657_s5 = inlined_call_operand.hbm [shape: bf16[64,128], index: 5, kind: output, shape index: {}]  }
   0x1   :  { %12 = vsyncpa [#allocation3 + $0x1], 0 }
   0x2   :  { %13 = vsyncpa [#allocation6], 0 }
   0x3   :  { %14 = vsyncpa [#allocation4], 0 }
   0x4   :  { %16 = vsyncpa [#allocation4 + $0x1], 0  ;;  %s1393_s18 = smov 0   ;;  %s1395_s19 = smov 0  }
   0x5   :  { %s1397_s20 = smov 0   ;;  %s1399_s21 = smov 0  }
   0x6 LB: > { %s1414_s22 = sadd.s32 4294967295, %s1351_s21   ;;  %s913_s23 = sadd.s32 4294967294, %s1351_s21   ;;  %s1351_s21 = sphi %s1399_s21, %s1677_s21   ;;  %s1347_s20 = sphi %s1397_s20, %s1676_s20   ;;  %s1343_s19 = sphi %s1395_s19, %s1675_s19   ;;  %s1339_s18 = sphi %s1393_s18, %s1674_s18  }
   0x7   : > { %p42_p0 = scmp.ne.s32.totalorder %s1343_s19, %s1339_s18  ;;  %p1658_p1 = scmp.eq.s32.totalorder %s1414_s22, 0 }
   0x8   : > { %p156_p3 = scmp.eq.s32.totalorder %s913_s23, 1  ;;  %p914_p5 = scmp.ge.s32.totalorder %s1351_s21, 1 }
   0x9   : > { %p1423_p4 = por %p1658_p1, %p42_p0  ;;  %p163_p7 = scmp.lt.s32.totalorder %s1351_s21, 3 }
   0xa   : > { %p1428_p6 = por %p156_p3, %p42_p0  ;;  %s1353_s27 = smov [#allocation5]  }
   0xb   : > { %s1661_s24 = scalar_select %p1423_p4, 1, 0 }
   0xc   : > { %s1662_s25 = scalar_select %p1428_p6, 1, 0 }
   0xd   : > { %p1433_p8 = pnand %p914_p5, %p163_p7  ;;  %s175_s28 = sshll.u32 %s1353_s27, 4  ;;  %s1437_s28 = int_to_ptr.vmem [resolvable:$true] %s175_s28 }
   0xe   : > { %s1354_s30 = smov [#allocation7]   ;;  %s1195_s9 = scalar_lea.hbm %s1653_s1, 4096 }
   0xf   : > { %p1094_p9 = pneg %p1433_p8  ;;  %s191_s6 = sshll.u32 %s1354_s30, 4  ;;  %s1448_s6 = int_to_ptr.vmem [resolvable:$true] %s191_s6 }
  0x10   : > { %p1196_p12 = scmp.ne.s32.totalorder %s1653_s1, %s1195_s9  ;;  %p1202_p5 = scmp.lt.u32.totalorder %s1195_s9, %s1653_s1 }
  0x11   : > { %p1444_p11 = pnand %p1094_p9, %p1658_p1 }
  0x13   : > { %p1197_p13 = pneg %p1444_p11 }
  0x15   : > { %p1198_p0 = pnand %p1197_p13, %p1196_p12 }
  0x17   : > { %p1199_p3 = pneg %p1198_p0 }
  0x19   : > { %p1204_p7 = pnand %p1202_p5, %p1199_p3 }
  0x1b   : > { %1207 = shalt.err (!%p1204_p7)
}
  0x1c   : > { %s1208_s14 = scalar_lea.vmem %s1437_s28, 4096  ;;  %p1216_p2 = scmp.lt.s32.totalorder %s1437_s28, %s1437_s28 }
  0x1d   : > { %p1209_p9 = scmp.ne.s32.totalorder %s1437_s28, %s1208_s14  ;;  %p1217_p12 = scmp.lt.s32.totalorder %s1208_s14, %s1208_s14 }
  0x1f   : > { %p1211_p10 = pnand %p1209_p9, %p1197_p13  ;;  %p1218_p0 = por %p1217_p12, %p1216_p2 }
  0x21   : > { %p1212_p1 = pneg %p1211_p10 }
  0x23   : > { %p1219_p6 = pnand %p1218_p0, %p1212_p1 }
  0x25   : > { %1222 = shalt.err (!%p1219_p6)
}
  0x26   : > { %s1355_s15 = smov 64   ;;  %s1356_s16 = smov 4  }
  0x27   : > { %1097 = dma.hbm_to_vmem [thread:$0]  (!%p1444_p11), %s1653_s1, 4096, %s1437_s28, [#allocation6], %s1355_s15, %s1355_s15, %s1356_s16  }
  0x28   : > { %s1223_s7 = scalar_lea.hbm %s1655_s3, 1024 }
  0x29   : > { %p1224_p2 = scmp.ne.s32.totalorder %s1655_s3, %s1223_s7  ;;  %p1230_p10 = scmp.lt.u32.totalorder %s1223_s7, %s1655_s3 }
  0x2b   : > { %p1226_p1 = pnand %p1224_p2, %p1197_p13 }
  0x2d   : > { %p1227_p6 = pneg %p1226_p1 }
  0x2f   : > { %p1232_p3 = pnand %p1230_p10, %p1227_p6 }
  0x31   : > { %1235 = shalt.err (!%p1232_p3)
}
  0x32   : > { %s1236_s28 = scalar_lea.vmem %s1448_s6, 1024  ;;  %p1244_p12 = scmp.lt.s32.totalorder %s1448_s6, %s1448_s6 }
  0x33   : > { %p1237_p5 = scmp.ne.s32.totalorder %s1448_s6, %s1236_s28  ;;  %p1245_p0 = scmp.lt.s32.totalorder %s1236_s28, %s1236_s28 }
  0x35   : > { %p1239_p7 = pnand %p1237_p5, %p1197_p13  ;;  %p1246_p2 = por %p1245_p0, %p1244_p12 }
  0x37   : > { %p1240_p9 = pneg %p1239_p7 }
  0x39   : > { %p1247_p1 = pnand %p1246_p2, %p1240_p9 }
  0x3b   : > { %1250 = shalt.err (!%p1247_p1)
}
  0x3c   : > { %1100 = dma.hbm_to_vmem [thread:$0]  (!%p1444_p11), %s1655_s3, 1024, %s1448_s6, [#allocation6], %s1355_s15, %s1355_s15, %s1356_s16  }
  0x3d   : > { %s1503_s14 = sadd.s32 1, %s1351_s21   ;;  %s29_s29 = sadd.s32 1, %s1347_s20 }
  0x3e   : > { %s26_s17 = ssub.s32 %s1351_s21, %s1503_s14  ;;  %p36_p13 = scmp.ne.s32.totalorder %s1347_s20, %s1343_s19 }
  0x3f   : > { %p27_p6 = scmp.eq.s32.totalorder %s26_s17, 0  ;;  %p37_p10 = scmp.eq.s32.totalorder %s1351_s21, 0 }
  0x40   : > { %p1665_p3 = scmp.eq.s32.totalorder %s1414_s22, 1  ;;  %p1111_p7 = scmp.lt.s32.totalorder %s1351_s21, 2 }
  0x41   : > { %s1519_s27 = scalar_select %p27_p6, %s1347_s20, %s29_s29  }
  0x42   : > { %p1513_p5 = por %p1665_p3, %p36_p13  ;;  %p38_p9 = por %p37_p10, %p36_p13 }
  0x43   : > { %s208_s30 = sand.u32 1, %s1347_s20   ;;  %s979_s6 = sshll.u32 %s1351_s21, 11 }
  0x44   : > { %s1666_s23 = scalar_select %p1513_p5, 1, 0 }
  0x45   : > { %s918_s7 = sshll.u32 %s208_s30, 7  ;;  %s1526_s8 = scalar_lea.hbm %s1652_s0, %s979_s6 }
  0x46   : > { %s212_s9 = scalar_lea.vmem [#allocation2], %s918_s7  ;;  %p1530_p11 = pnand %p1111_p7, %p38_p9 }
  0x47   : > { %s220_s10 = sshll.u32 %s212_s9, 4  ;;  %s1534_s28 = scalar_lea.sflag [#allocation3], %s208_s30  ;;  %s1528_s10 = int_to_ptr.vmem [resolvable:$true] %s220_s10 }
  0x48   : > { %s1251_s12 = scalar_lea.hbm %s1526_s8, 2048  ;;  %p1253_p0 = pneg %p1530_p11 }
  0x49   : > { %p1252_p12 = scmp.ne.s32.totalorder %s1526_s8, %s1251_s12  ;;  %s1256_s17 = scalar_lea.hbm %s1652_s0, 4096 }
  0x4a   : > { %p1257_p13 = scmp.lt.u32.totalorder %s1526_s8, %s1652_s0  ;;  %p1258_p6 = scmp.lt.u32.totalorder %s1256_s17, %s1251_s12 }
  0x4b   : > { %p1254_p2 = pnand %p1253_p0, %p1252_p12  ;;  %p1260_p3 = scmp.lt.u32.totalorder %s1251_s12, %s1526_s8 }
  0x4c   : > { %p1259_p10 = por %p1258_p6, %p1257_p13 }
  0x4d   : > { %p1255_p1 = pneg %p1254_p2 }
  0x4e   : > { %p1261_p7 = por %p1260_p3, %p1259_p10 }
  0x50   : > { %p1262_p9 = pnand %p1261_p7, %p1255_p1 }
  0x52   : > { %1265 = shalt.err (!%p1262_p9)
}
  0x53   : > { %s1266_s30 = scalar_lea.vmem %s1528_s10, 2048  ;;  %s1357_s15 = smov [#allocation2]  }
  0x54   : > { %p1267_p12 = scmp.ne.s32.totalorder %s1528_s10, %s1266_s30  ;;  %s1271_s16 = sshll.u32 %s1357_s15, 4  ;;  %s1272_s16 = int_to_ptr.vmem [resolvable:$false] %s1271_s16 }
  0x55   : > { %s1273_s9 = scalar_lea.vmem %s1272_s16, 4096  ;;  %p1274_p4 = scmp.lt.s32.totalorder %s1528_s10, %s1272_s16 }
  0x56   : > { %p1269_p2 = pnand %p1267_p12, %p1253_p0  ;;  %p1275_p13 = scmp.lt.s32.totalorder %s1273_s9, %s1266_s30 }
  0x58   : > { %p1270_p5 = pneg %p1269_p2  ;;  %p1276_p6 = por %p1275_p13, %p1274_p4 }
  0x5a   : > { %p1277_p10 = pnand %p1276_p6, %p1270_p5 }
  0x5c   : > { %1280 = shalt.err (!%p1277_p10)
}
  0x5d   : > { %s1358_s12 = smov 512   ;;  %s1359_s13 = smov 32  }
  0x5e   : > { %1104 = dma.hbm_to_vmem [thread:$0]  (!%p1530_p11), %s1526_s8, 2048, %s1528_s10, %s1534_s28, %s1358_s12, %s1358_s12, %s1359_s13  }
  0x5f   : > { %232 = sbr.rel (%p1433_p8) target bundleno = 607 (0x25f), region = 40  ;;  %s1565_s29 = sand.u32 (!%p1433_p8), 1, %s1343_s19  }
  0x60   : > { %s923_s17 = sshll.u32 (!%p1433_p8), %s1565_s29, 7  ;;  %s235_s7 = scalar_lea.sflag (!%p1433_p8), [#allocation3], %s1565_s29 }
  0x61   : > { %s1569_s6 = scalar_lea.vmem (!%p1433_p8), [#allocation2], %s923_s17  ;;  %p1668_p4 = scmp.ne.s32.totalorder (!%p1433_p8), %s1661_s24, 0 }
  0x66   : > { %1326 = dma.done.wait (%p1668_p4), %s235_s7, 2048  }
  0x67   : > { %1328 = vsyncadd (%p1668_p4), %s235_s7, 4294965248  ;;  %p1669_p5 = scmp.eq.s32.totalorder %s1414_s22, 0 }
  0x69   : > { %1330 = dma.done.wait (%p1669_p5), [#allocation6], 5120   ;;  %p1670_p8 = pmov %p1669_p5 }
  0x6a   : > { %v1155_v0 = vld [vmem:[#allocation5 + $0x40] sm:$0xff]   ;;  %v1159_v4 = vld [vmem:[#allocation5 + $0x48] sm:$0xff]   ;;  %v1163_v8 = vld [vmem:[#allocation5 + $0x50] sm:$0xff]   ;;  %s926_s8 = sshll.u32 %s1565_s29, 4  ;;  %s984_s15 = sshll.u32 %s1414_s22, 8 }
  0x6b   : > { %1332 = vsyncadd (%p1670_p8), [#allocation6], 4294962176  ;;  %v1156_v1 = vld [vmem:[#allocation5 + $0xc0] sm:$0xff]   ;;  %996 = vmatprep.subr.bf16.mxu0 %v1155_v0  ;;  %v1160_v5 = vld [vmem:[#allocation5 + $0xc8] sm:$0xff]   ;;  %s272_s28 = scalar_lea.vmem [#allocation8], %s926_s8  ;;  %s1608_s12 = scalar_lea.hbm %s1657_s5, %s984_s15 }
  0x6c   : > { %v1157_v2 = vld [vmem:[#allocation5] sm:$0xff]   ;;  %1024 = vmatprep.subr.bf16.mxu1 %v1156_v1  ;;  %v1161_v6 = vld [vmem:[#allocation5 + $0x8] sm:$0xff]   ;;  %v1164_v9 = vld [vmem:[#allocation5 + $0xd0] sm:$0xff]   ;;  %s821_s30 = sshll.u32 %s272_s28, 4  ;;  %s808_s13 = scalar_lea.sflag [#allocation4], %s1565_s29  ;;  %s1603_s30 = int_to_ptr.vmem [resolvable:$true] %s821_s30 }
  0x6d   : > { %v1158_v3 = vld [vmem:[#allocation5 + $0x80] sm:$0xff]   ;;  %997 = vmatpush3.bf16.msra.mxu0 %v1157_v2  ;;  %v1162_v7 = vld [vmem:[#allocation5 + $0x88] sm:$0xff]   ;;  %v1165_v10 = vld [vmem:[#allocation5 + $0x10] sm:$0xff]   ;;  %s1281_s17 = scalar_lea.vmem %s1603_s30, 256  ;;  %p1671_p0 = scmp.ne.s32.totalorder %s1666_s23, 0 }
  0x6e   : > { %1025 = vmatpush3.bf16.msra.mxu1 %v1158_v3  ;;  %998 = vmatprep.subr.bf16.mxu0 %v1159_v4  ;;  %v1166_v11 = vld [vmem:[#allocation5 + $0x90] sm:$0xff]   ;;  %v1167_v12 = vld [vmem:[#allocation5 + $0x58] sm:$0xff]   ;;  %v1171_v16 = vld [vmem:[#allocation5 + $0x60] sm:$0xff]   ;;  %p1282_p11 = scmp.ne.s32.totalorder %s1603_s30, %s1281_s17  ;;  %s1360_s22 = smov [#allocation8]  }
  0x6f   : > { %1026 = vmatprep.subr.bf16.mxu1 %v1160_v5  ;;  %v1168_v13 = vld [vmem:[#allocation5 + $0xd8] sm:$0xff]   ;;  %v1172_v17 = vld [vmem:[#allocation5 + $0xe0] sm:$0xff]   ;;  %v1175_v20 = vld [vmem:[#allocation5 + $0x68] sm:$0xff]   ;;  %s1285_s7 = sshll.u32 %s1360_s22, 4  ;;  %s1286_s7 = int_to_ptr.vmem [resolvable:$false] %s1285_s7 }
  0x70   : > { %v1169_v14 = vld [vmem:[#allocation5 + $0x18] sm:$0xff]   ;;  %v1173_v18 = vld [vmem:[#allocation5 + $0x20] sm:$0xff]   ;;  %v1176_v21 = vld [vmem:[#allocation5 + $0xe8] sm:$0xff]   ;;  %p1283_p1 = pnand %p1282_p11, %p1671_p0  ;;  %p1288_p7 = scmp.lt.s32.totalorder %s1603_s30, %s1286_s7 }
  0x71   : > { %999 = vmatpush3.bf16.msra.mxu0 %v1161_v6  ;;  %v1170_v15 = vld [vmem:[#allocation5 + $0x98] sm:$0xff]   ;;  %v1174_v19 = vld [vmem:[#allocation5 + $0xa0] sm:$0xff]   ;;  %v1177_v22 = vld [vmem:[#allocation5 + $0x28] sm:$0xff]  }
  0x72   : > { %1027 = vmatpush3.bf16.msra.mxu1 %v1162_v7  ;;  %1000 = vmatprep.subr.bf16.mxu0 %v1163_v8  ;;  %v1178_v23 = vld [vmem:[#allocation5 + $0xa8] sm:$0xff]   ;;  %v1179_v24 = vld [vmem:[#allocation5 + $0x70] sm:$0xff]   ;;  %v1183_v28 = vld [vmem:[#allocation5 + $0x78] sm:$0xff]   ;;  %p1284_p3 = pneg %p1283_p1 }
  0x73   : > { %1028 = vmatprep.subr.bf16.mxu1 %v1164_v9  ;;  %v1180_v25 = vld [vmem:[#allocation5 + $0xf0] sm:$0xff]   ;;  %v1184_v29 = vld [vmem:[#allocation5 + $0xf8] sm:$0xff]   ;;  %v277_v32 = vld [vmem:[%s1569_s6 + $0x8] sm:$0xff] }
  0x74   : > { %v1181_v26 = vld [vmem:[#allocation5 + $0x30] sm:$0xff]   ;;  %v1185_v30 = vld [vmem:[#allocation5 + $0x38] sm:$0xff]   ;;  %v281_v33 = vld [vmem:[%s1569_s6 + $0x28] sm:$0xff] }
  0x75   : > { %1001 = vmatpush3.bf16.msra.mxu0 %v1165_v10  ;;  %v1182_v27 = vld [vmem:[#allocation5 + $0xb0] sm:$0xff]   ;;  %v1186_v31 = vld [vmem:[#allocation5 + $0xb8] sm:$0xff]   ;;  %v293_v35 = vpack.c.bf16 %v281_v33, %v277_v32  ;;  %v276_v37 = vld [vmem:[%s1569_s6] sm:$0xff] }
  0x76   : > { %1029 = vmatpush3.bf16.msra.mxu1 %v1166_v11  ;;  %1002 = vmatprep.subr.bf16.mxu0 %v1167_v12  ;;  %v279_v34 = vld [vmem:[%s1569_s6 + $0x18] sm:$0xff]  ;;  %v280_v38 = vld [vmem:[%s1569_s6 + $0x20] sm:$0xff]  ;;  %v278_v41 = vld [vmem:[%s1569_s6 + $0x10] sm:$0xff] }
  0x77   : > { %1030 = vmatprep.subr.bf16.mxu1 %v1168_v13  ;;  %v283_v36 = vld [vmem:[%s1569_s6 + $0x38] sm:$0xff]  ;;  %v292_v40 = vpack.c.bf16 %v280_v38, %v276_v37  ;;  %v282_v42 = vld [vmem:[%s1569_s6 + $0x30] sm:$0xff]  ;;  %v285_v43 = vld [vmem:[%s1569_s6 + $0x48] sm:$0xff]  ;;  %595 = vmatprep.mubr.bf16.mxu0 %v293_v35 }
  0x78   : > { %v295_v39 = vpack.c.bf16 %v283_v36, %v279_v34  ;;  %v294_v44 = vpack.c.bf16 %v282_v42, %v278_v41  ;;  %v289_v45 = vld [vmem:[%s1569_s6 + $0x68] sm:$0xff]  ;;  %v287_v46 = vld [vmem:[%s1569_s6 + $0x58] sm:$0xff]  ;;  %v284_v50 = vld [vmem:[%s1569_s6 + $0x40] sm:$0xff] }
  0x79   : > { %1003 = vmatpush3.bf16.msra.mxu0 %v1169_v14  ;;  %v291_v47 = vld [vmem:[%s1569_s6 + $0x78] sm:$0xff]  ;;  %v297_v48 = vpack.c.bf16 %v289_v45, %v285_v43  ;;  %v288_v51 = vld [vmem:[%s1569_s6 + $0x60] sm:$0xff]  ;;  %v286_v52 = vld [vmem:[%s1569_s6 + $0x50] sm:$0xff] }
  0x7a   : > { %1031 = vmatpush3.bf16.msra.mxu1 %v1170_v15  ;;  %1004 = vmatprep.subr.bf16.mxu0 %v1171_v16  ;;  %v299_v49 = vpack.c.bf16 %v291_v47, %v287_v46  ;;  %v290_v53 = vld [vmem:[%s1569_s6 + $0x70] sm:$0xff]  ;;  %v1187_v54 = vld [vmem:[#allocation7] sm:$0xff]   ;;  %v1188_v55 = vld [vmem:[#allocation7 + $0x8] sm:$0xff]   ;;  %v296_v56 = vpack.c.bf16 %v288_v51, %v284_v50  ;;  %s1287_s6 = scalar_lea.vmem %s1286_s7, 512 }
  0x7b   : > { %1032 = vmatprep.subr.bf16.mxu1 %v1172_v17  ;;  %644 = vmatprep.mubr.bf16.mxu1 %v295_v39  ;;  %v1189_v57 = vld [vmem:[#allocation7 + $0x10] sm:$0xff]   ;;  %v298_v58 = vpack.c.bf16 %v290_v53, %v286_v52  ;;  %v1190_v59 = vld [vmem:[#allocation7 + $0x18] sm:$0xff]   ;;  %v1191_v60 = vld [vmem:[#allocation7 + $0x20] sm:$0xff]   ;;  %p1289_p9 = scmp.lt.s32.totalorder %s1287_s6, %s1281_s17 }
  0x7c   : > { %v1192_v61 = vld [vmem:[#allocation7 + $0x28] sm:$0xff]   ;;  %v1193_v62 = vld [vmem:[#allocation7 + $0x30] sm:$0xff]   ;;  %v1194_v63 = vld [vmem:[#allocation7 + $0x38] sm:$0xff]  }
  0x7d   : > { %1005 = vmatpush3.bf16.msra.mxu0 %v1173_v18  ;;  %v927_v2 = vld [vmem:[%s1654_s2] ss:$0 sm:$0xff]  ;;  %p1290_p12 = por %p1289_p9, %p1288_p7 }
  0x7e   : > { %1033 = vmatpush3.bf16.msra.mxu1 %v1174_v19  ;;  %1006 = vmatprep.subr.bf16.mxu0 %v1175_v20 }
  0x7f   : > { %1034 = vmatprep.subr.bf16.mxu1 %v1176_v21  ;;  %p1291_p2 = pnand %p1290_p12, %p1284_p3 }
  0x81   : > { %1007 = vmatpush3.bf16.msra.mxu0 %v1177_v22 }
  0x82   : > { %1035 = vmatpush3.bf16.msra.mxu1 %v1178_v23  ;;  %1008 = vmatprep.subr.bf16.mxu0 %v1179_v24 }
  0x83   : > { %1036 = vmatprep.subr.bf16.mxu1 %v1180_v25 }
  0x85   : > { %1009 = vmatpush3.bf16.msra.mxu0 %v1181_v26 }
  0x86   : > { %1037 = vmatpush3.bf16.msra.mxu1 %v1182_v27  ;;  %1010 = vmatprep.subr.bf16.mxu0 %v1183_v28 }
  0x87   : > { %1038 = vmatprep.subr.bf16.mxu1 %v1184_v29 }
  0x89   : > { %1011 = vmatpush3.bf16.msra.mxu0 %v1185_v30 }
  0x8a   : > { %1039 = vmatpush3.bf16.msra.mxu1 %v1186_v31  ;;  %1062 = vmatprep.subr.bf16.mxu0 %v1187_v54 }
  0x8c   : > { %596 = vmatmul.mubr.bf16.vlgmr.msra.gmra.mrb[0].mxu0 %v292_v40  ;;  %v960_v40 = vld [vmem:[%s1656_s4] ss:$0 sm:$0xff] }
  0x8d   : > { %645 = vmatmul.mubr.bf16.vlgmr.msra.gmra.mrb[0].mxu1 %v294_v44  ;;  %603 = vmatprep.mubr.bf16.mxu0 %v297_v48 }
  0x8e   : > { %652 = vmatprep.mubr.bf16.mxu1 %v299_v49  ;;  %1063 = vmatpush3.bf16.msra.mxu0 %v1187_v54 }
  0x8f   : > { %1064 = vmatprep.subr.bf16.mxu0 %v1188_v55 }
  0x92   : > { %1065 = vmatpush3.bf16.msra.mxu0 %v1188_v55 }
  0x93   : > { %1066 = vmatprep.subr.bf16.mxu0 %v1189_v57 }
  0x94   : > { %604 = vmatmul.mubr.bf16.gmra.mrb[4].mxu0 %v296_v56 }
  0x95   : > { %653 = vmatmul.mubr.bf16.gmra.mrb[4].mxu1 %v298_v58 }
  0x96   : > { %1067 = vmatpush3.bf16.msra.mxu0 %v1189_v57 }
  0x97   : > { %1068 = vmatprep.subr.bf16.mxu0 %v1190_v59 }
  0x9a   : > { %1069 = vmatpush3.bf16.msra.mxu0 %v1190_v59 }
  0x9b   : > { %1070 = vmatprep.subr.bf16.mxu0 %v1191_v60 }
  0x9e   : > { %1071 = vmatpush3.bf16.msra.mxu0 %v1191_v60 }
  0x9f   : > { %1072 = vmatprep.subr.bf16.mxu0 %v1192_v61 }
  0xa2   : > { %1073 = vmatpush3.bf16.msra.mxu0 %v1192_v61 }
  0xa3   : > { %1074 = vmatprep.subr.bf16.mxu0 %v1193_v62 }
  0xa6   : > { %1075 = vmatpush3.bf16.msra.mxu0 %v1193_v62 }
  0xa7   : > { %1076 = vmatprep.subr.bf16.mxu0 %v1194_v63 }
  0xaa   : > { %1077 = vmatpush3.bf16.msra.mxu0 %v1194_v63 }
 0x15f   : > { %v1012_v0 = vpop.f32.mrb[0].mxu0 }
 0x160   : > { %v1040_v1 = vpop.f32.mrb[0].mxu1  ;;  %v1013_v3 = vpop.f32.mrb[1].mxu0 }
 0x161   : > { %v1014_v4 = vadd.f32 %v1013_v3, %v1012_v0  ;;  %v1041_v5 = vpop.f32.mrb[1].mxu1  ;;  %v1015_v6 = vpop.f32.mrb[2].mxu0 }
 0x162   : > { %v1042_v7 = vadd.f32 %v1041_v5, %v1040_v1  ;;  %v1043_v8 = vpop.f32.mrb[2].mxu1  ;;  %v1016_v9 = vpop.f32.mrb[3].mxu0 }
 0x163   : > { %v598_v10 = vadd.f32 %v1014_v4, %v927_v2  ;;  %v1017_v11 = vadd.f32 %v1016_v9, %v1015_v6  ;;  %v1044_v12 = vpop.f32.mrb[3].mxu1 }
 0x164   : > { %v1045_v13 = vadd.f32 %v1044_v12, %v1043_v8 }
 0x165   : > { %v647_v14 = vadd.f32 %v1042_v7, %v598_v10  ;;  %v601_v15 = vadd.f32 %v1017_v11, %v927_v2 }
 0x167   : > { %v650_v16 = vadd.f32 %v1045_v13, %v601_v15  ;;  %v1018_v17 = vpop.f32.mrb[4].mxu0  ;;  %v661_v20 = vmax.f32 %v647_v14, 0.0 }
 0x168   : > { %v1046_v18 = vpop.f32.mrb[4].mxu1  ;;  %v1019_v19 = vpop.f32.mrb[5].mxu0 }
 0x169   : > { %v662_v21 = vmax.f32 %v650_v16, 0.0  ;;  %v1020_v22 = vadd.f32 %v1019_v19, %v1018_v17  ;;  %v1047_v23 = vpop.f32.mrb[5].mxu1  ;;  %v1021_v24 = vpop.f32.mrb[6].mxu0 }
 0x16a   : > { %v1048_v25 = vadd.f32 %v1047_v23, %v1046_v18  ;;  %v1049_v26 = vpop.f32.mrb[6].mxu1  ;;  %v1022_v27 = vpop.f32.mrb[7].mxu0 }
 0x16b   : > { %v606_v28 = vadd.f32 %v1020_v22, %v927_v2  ;;  %v1023_v29 = vadd.f32 %v1022_v27, %v1021_v24  ;;  %v1050_v30 = vpop.f32.mrb[7].mxu1  ;;  %v665_v31 = vpack.c.bf16 %v662_v21, %v661_v20 }
 0x16c   : > { %v1051_v32 = vadd.f32 %v1050_v30, %v1049_v26 }
 0x16d   : > { %v655_v33 = vadd.f32 %v1048_v25, %v606_v28  ;;  %v609_v34 = vadd.f32 %v1023_v29, %v927_v2  ;;  %1078 = vmatprep.mubr.bf16.mxu0 %v665_v31 }
 0x16f   : > { %v658_v35 = vadd.f32 %v1051_v32, %v609_v34  ;;  %v663_v36 = vmax.f32 %v655_v33, 0.0 }
 0x171   : > { %v664_v37 = vmax.f32 %v658_v35, 0.0 }
 0x173   : > { %v666_v38 = vpack.c.bf16 %v664_v37, %v663_v36 }
 0x175   : > { %1079 = vmatmul.mubr.bf16.vlgmr.msra.gmra.mrb[8].mxu0 %v666_v38 }
 0x248   : > { %v1080_v39 = vpop.f32.mrb[8].mxu0 }
 0x249   : > { %v772_v41 = vpop.f32.mrb[9].mxu0  ;;  %v781_v43 = vadd.f32 %v1080_v39, %v960_v40 }
 0x24a   : > { %v1081_v42 = vpop.f32.mrb[10].mxu0  ;;  %v773_v46 = vadd.f32 %v960_v40, %v772_v41 }
 0x24b   : > { %v784_v44 = vadd.f32 %v1081_v42, %v960_v40  ;;  %v775_v45 = vpop.f32.mrb[11].mxu0 }
 0x24c   : > { %v776_v47 = vadd.f32 %v960_v40, %v775_v45 }
 0x24d   : > { %v993_v48 = vpack.c.bf16 %v784_v44, %v781_v43 }
 0x24e   : > { %v988_v49 = vpack.c.bf16 %v776_v47, %v773_v46 }
 0x24f   : > { %995 = vst [vmem:[%s272_s28 + $0x8] sm:$0xff] %v993_v48  }
 0x250   : > { %989 = vst [vmem:[%s272_s28] sm:$0xff] %v988_v49  }
 0x251   : > { %1294 = shalt.err (!%p1291_p2)
}
 0x252   : > { %s1295_s24 = scalar_lea.hbm %s1608_s12, 256  ;;  %s1299_s10 = scalar_lea.hbm %s1657_s5, 512 }
 0x253   : > { %p1296_p13 = scmp.ne.s32.totalorder %s1608_s12, %s1295_s24  ;;  %p1300_p4 = scmp.lt.u32.totalorder %s1608_s12, %s1657_s5 }
 0x254   : > { %p1301_p5 = scmp.lt.u32.totalorder %s1299_s10, %s1295_s24  ;;  %p1303_p11 = scmp.lt.u32.totalorder %s1295_s24, %s1608_s12 }
 0x255   : > { %p1297_p6 = pnand %p1296_p13, %p1671_p0 }
 0x256   : > { %p1302_p8 = por %p1301_p5, %p1300_p4 }
 0x257   : > { %p1298_p10 = pneg %p1297_p6 }
 0x258   : > { %p1304_p1 = por %p1303_p11, %p1302_p8 }
 0x25a   : > { %p1305_p3 = pnand %p1304_p1, %p1298_p10 }
 0x25c   : > { %1308 = shalt.err (!%p1305_p3)
}
 0x25d   : > { %s1361_s15 = smov 64   ;;  %s1362_s16 = smov 4  }
 0x25e   : > { %1092 = dma.vmem_to_hbm [thread:$0]  (%p1671_p0), %s1603_s30, 256, %s1608_s12, %s808_s13, %s1361_s15, %s1361_s15, %s1362_s16  }
 0x25f PF: > { %s836_s9 = sand.u32 1, %s1339_s18   ;;  %p1672_p7 = scmp.ne.s32.totalorder %s1662_s25, 0 }
 0x260   : > { %p1673_p9 = scmp.ge.s32.totalorder %s1351_s21, 2  ;;  %s837_s17 = scalar_lea.sflag [#allocation4], %s836_s9 }
 0x262   : > { %p1106_p12 = pnand %p1673_p9, %p1672_p7 }
 0x264   : > { %1334 = dma.done.wait (!%p1106_p12), %s837_s17, 256  }
 0x265   : > { %1336 = vsyncadd (!%p1106_p12), %s837_s17, 4294967040  ;;  %p19_p2 = scmp.ge.s32.totalorder %s1503_s14, 4   ;;  %s1674_s18 = smov %s1343_s19 }
 0x266   : > { %s1675_s19 = smov %s1347_s20  ;;  %s1676_s20 = smov %s1519_s27 }
 0x267   : > { %s1677_s21 = smov %s1503_s14  ;;  %21 = sbr.rel (!%p19_p2) target bundleno = 6 (0x6), region = 93 }
 0x26e   :  { %842 = vsyncpa [#allocation3], 1 }
 0x26f   :  { %844 = vsyncpa [#allocation3 + $0x1], 1 }
 0x270   :  { %845 = vsyncpa [#allocation6], 1 }
 0x271   :  { %846 = vsyncpa [#allocation4], 1 }
 0x272   :  { %848 = vsyncpa [#allocation4 + $0x1], 1 }

</bundles_post_ra>
